<compile_context>
chip_gen: v5e
topology: v5e:2x2
jax: 0.10.0
libtpu: 0.0.40
codegen_flags: <defaults>
</compile_context>

<pallas_src>
from collections import namedtuple

import jax
import jax.numpy as jnp
from jax import lax
from jax.experimental import pallas as pl
from jax.experimental.pallas import tpu as pltpu

H1, H2, H3 = 32, 64, 64
_HPAD = 64          # every layer padded to 64x64 inside the packed weight buffer
_LANE = 128
_MAX_TILE = 4096    # VMEM is not the constraint; just bounds per-step DMA size
_VREG_CHUNK = 256   # in-kernel lane chunk: keeps f32 [64, chunk] under 64 vregs

PackedParams = namedtuple("PackedParams", ["w", "b", "state_size", "action_size"])


def pack_params(params):
    """Pack the four (W, b) pairs into two zero-padded f32 buffers.

    w_packed: [4, 64, 64]  (layer i's [out, in] placed at [i, :out, :in])
    b_packed: [64, 4]      (layer i's bias in column i, rows [:out])
    Zero padding keeps the padded rows/cols mathematically inert.
    """
    (w1, b1), (w2, b2), (w3, b3), (w4, b4) = params
    S, A = w1.shape[1], w4.shape[0]

    def pad_w(w):
        o, i = w.shape
        return jnp.zeros((_HPAD, _HPAD), jnp.float32).at[:o, :i].set(
            w.astype(jnp.float32))

    def pad_b(b):
        return jnp.zeros((_HPAD,), jnp.float32).at[: b.shape[0]].set(
            b.astype(jnp.float32))

    w_packed = jnp.stack([pad_w(w1), pad_w(w2), pad_w(w3), pad_w(w4)])     # [4,64,64]
    b_packed = jnp.stack([pad_b(b1), pad_b(b2), pad_b(b3), pad_b(b4)], 1)  # [64,4]
    return PackedParams(w_packed, b_packed, S, A)


def _make_kernel(S, A, batch_tile):
    # Static lane-chunk schedule (unrolled): each chunk's intermediates die
    # before the next chunk starts, bounding vreg pressure for large tiles.
    chunks, off = [], 0
    while off < batch_tile:
        size = min(_VREG_CHUNK, batch_tile - off)
        chunks.append((off, size))
        off += size

    def kernel(x_ref, w_ref, b_ref, o_ref):
        # x_ref: [batch_tile, S]  natural row-major input block (f32)
        # w_ref: [4, 64, 64]      zero-padded weights (constant across grid)
        # b_ref: [64, 4]          zero-padded biases  (constant across grid)
        # o_ref: [A, batch_tile]  lane-dense Q-value output
        for off, size in chunks:
            xc = x_ref[off:off + size, :]                            # [size, S]
            # Layer 1: contract on S (last dim of both operands) -> [64, size].
            # The tiny [size, S] relayout to feed the MXU rides the idle XLU.
            h = lax.dot_general(
                w_ref[0][:, :S], xc,
                dimension_numbers=(((1,), (1,)), ((), ())),
                preferred_element_type=jnp.float32)
            h = jnp.maximum(h + b_ref[:, 0:1], 0.0)
            h = jnp.maximum(
                jnp.dot(w_ref[1], h, preferred_element_type=jnp.float32)
                + b_ref[:, 1:2], 0.0)
            h = jnp.maximum(
                jnp.dot(w_ref[2], h, preferred_element_type=jnp.float32)
                + b_ref[:, 2:3], 0.0)
            q = jnp.dot(w_ref[3], h, preferred_element_type=jnp.float32)[:A, :]
            o_ref[:, off:off + size] = (q + b_ref[:A, 3:4]).astype(o_ref.dtype)

    return kernel


def _num_tensorcores():
    # v7x exposes 2 TensorCores per chip; v5e/v6e have 1.  Best-effort detection;
    # defaulting to 1 is always correct (it just leaves a v7x core idle).
    try:
        kind = jax.devices()[0].device_kind.lower()
    except Exception:
        return 1
    return 2 if "v7" in kind else 1


def _choose_batch_tile(B):
    # Fewer, bigger grid steps: one block on 1-TC chips, two balanced blocks on
    # v7x.  Never fall back to many tiny 128-wide steps — per-step fixed
    # overhead dominates this kernel's compute.
    if B < _LANE or B % _LANE != 0:
        return B                      # tiny / unaligned batch: single full block
    steps = _num_tensorcores()
    while steps <= B // _LANE:
        tile = B // steps
        if B % steps == 0 and tile % _LANE == 0 and tile <= _MAX_TILE:
            return tile
        steps += 1
    return _LANE


def qnetwork_forward(state, params, *, batch_tile=None):
    """state: [B, state_size] f32 -> [B, action_size] f32 (QNetwork.forward)."""
    packed = params if isinstance(params, PackedParams) else pack_params(params)
    B, S = state.shape
    A = packed.action_size
    assert S == packed.state_size

    if batch_tile is None:
        batch_tile = _choose_batch_tile(B)
    assert B % batch_tile == 0, "batch must be divisible by batch_tile"
    assert batch_tile == B or batch_tile % _LANE == 0

    grid = (B // batch_tile,)
    const = lambda shape: pl.BlockSpec(shape, lambda i, s=len(shape): (0,) * s)

    out_t = pl.pallas_call(
        _make_kernel(S, A, batch_tile),
        out_shape=jax.ShapeDtypeStruct((A, B), jnp.float32),
        grid_spec=pltpu.PrefetchScalarGridSpec(
            num_scalar_prefetch=0,
            grid=grid,
            in_specs=[
                pl.BlockSpec((batch_tile, S), lambda i: (i, 0)),  # natural x block
                const((4, _HPAD, _HPAD)),                         # packed weights
                const((_HPAD, 4)),                                # packed biases
            ],
            out_specs=pl.BlockSpec((A, batch_tile), lambda i: (0, i)),
        ),
        compiler_params=pltpu.CompilerParams(
            dimension_semantics=("parallel",)),
    )(state.astype(jnp.float32), packed.w, packed.b)

    # [A, B] -> [B, A]: tiny (action_size rows); the kernel output stays
    # lane-dense, only this trivial transpose remains in the wrapper.
    return out_t.T


def init_params(key, state_size, action_size):
    """PyTorch-style Linear init: W [out, in], b [out], uniform +/- 1/sqrt(fan_in)."""
    dims = [(state_size, H1), (H1, H2), (H2, H3), (H3, action_size)]
    params = []
    for fin, fout in dims:
        key, kw, kb = jax.random.split(key, 3)
        bound = 1.0 / (fin ** 0.5)
        w = jax.random.uniform(kw, (fout, fin), jnp.float32, -bound, bound)
        b = jax.random.uniform(kb, (fout,), jnp.float32, -bound, bound)
        params.append((w, b))
    return params


def qnetwork_reference(state, params):
    """Pure f32 reference matching the PyTorch forward pass."""
    (w1, b1), (w2, b2), (w3, b3), (w4, b4) = params
    h = jnp.maximum(state @ w1.T + b1, 0.0)
    h = jnp.maximum(h @ w2.T + b2, 0.0)
    h = jnp.maximum(h @ w3.T + b3, 0.0)
    return h @ w4.T + b4


if __name__ == "__main__":
    key = jax.random.PRNGKey(0)
    state_size, action_size, batch = 8, 4, 256

    kp, kx = jax.random.split(key)
    params = init_params(kp, state_size, action_size)
    state = jax.random.normal(kx, (batch, state_size), jnp.float32)

    packed = pack_params(params)          # pack once, reuse across forward calls
    out = qnetwork_forward(state, packed)
    out = jax.block_until_ready(out)

    ref = qnetwork_reference(state, params)
    assert out.shape == (batch, action_size)
    # Weights/activations are f32 end-to-end; tolerance stays conservative only
    # because MXU default precision may still take bf16 multiplicand passes.
    err = float(jnp.max(jnp.abs(out - ref)))
    assert jnp.allclose(out, ref, atol=5e-2, rtol=5e-2), err

    print("KERNEL_OK")
</pallas_src>

<mosaic_0001>
module attributes {stable_mosaic.version = 11 : i64} {
  func.func @kernel(%arg0: i32, %arg1: memref<256x8xf32, #tpu.memory_space<vmem>>, %arg2: memref<4x64x64xf32, #tpu.memory_space<vmem>>, %arg3: memref<64x4xf32, #tpu.memory_space<vmem>>, %arg4: memref<4x256xf32, #tpu.memory_space<vmem>>) attributes {dimension_semantics = [#tpu.dimension_semantics<parallel>], iteration_bounds = array<i64: 1>, scalar_prefetch = 0 : i64, scratch_operands = 0 : i64, tpu.core_type = #tpu.core_type<tc>, window_params = [{transform_indices = @transform_0, window_bounds = array<i64: 256, 8>}, {pipeline_mode = #tpu.pipeline_mode<synchronous>, transform_indices = @transform_1, window_bounds = array<i64: 4, 64, 64>}, {pipeline_mode = #tpu.pipeline_mode<synchronous>, transform_indices = @transform_2, window_bounds = array<i64: 64, 4>}, {transform_indices = @transform_3, window_bounds = array<i64: 4, 256>}]} {
    %c0 = arith.constant 0 : index
    %c0_0 = arith.constant 0 : index
    %0 = vector.load %arg1[%c0, %c0_0] : memref<256x8xf32, #tpu.memory_space<vmem>>, vector<256x8xf32>
    %c0_1 = arith.constant 0 : index
    %c0_2 = arith.constant 0 : index
    %c0_3 = arith.constant 0 : index
    %1 = vector.load %arg2[%c0_1, %c0_2, %c0_3] : memref<4x64x64xf32, #tpu.memory_space<vmem>>, vector<1x64x64xf32>
    %2 = vector.shape_cast %1 : vector<1x64x64xf32> to vector<64x64xf32>
    %3 = vector.extract_strided_slice %2 {offsets = [0, 0], sizes = [64, 8], strides = [1, 1]} : vector<64x64xf32> to vector<64x8xf32>
    %cst = arith.constant dense<0.000000e+00> : vector<64x256xf32>
    %4 = tpu.matmul %3, %0, %cst {dimension_numbers = #tpu.dot_dimension_numbers<[1], [1], [0], [0], [0, 0, 1, 0], [], []>} : vector<64x8xf32>, vector<256x8xf32>, vector<64x256xf32> -> vector<64x256xf32>
    %c0_4 = arith.constant 0 : index
    %c0_5 = arith.constant 0 : index
    %5 = vector.load %arg3[%c0_4, %c0_5] : memref<64x4xf32, #tpu.memory_space<vmem>>, vector<64x1xf32>
    %6 = vector.broadcast %5 : vector<64x1xf32> to vector<64x256xf32>
    %7 = arith.addf %4, %6 : vector<64x256xf32>
    %cst_6 = arith.constant 0.000000e+00 : f32
    %8 = vector.broadcast %cst_6 : f32 to vector<64x256xf32>
    %9 = arith.maximumf %7, %8 : vector<64x256xf32>
    %c1 = arith.constant 1 : index
    %c0_7 = arith.constant 0 : index
    %c0_8 = arith.constant 0 : index
    %10 = vector.load %arg2[%c1, %c0_7, %c0_8] : memref<4x64x64xf32, #tpu.memory_space<vmem>>, vector<1x64x64xf32>
    %11 = vector.shape_cast %10 : vector<1x64x64xf32> to vector<64x64xf32>
    %cst_9 = arith.constant dense<0.000000e+00> : vector<64x256xf32>
    %12 = tpu.matmul %11, %9, %cst_9 {dimension_numbers = #tpu.dot_dimension_numbers<[1], [0], [0], [1], [0, 0, 1, 1], [], []>} : vector<64x64xf32>, vector<64x256xf32>, vector<64x256xf32> -> vector<64x256xf32>
    %c0_10 = arith.constant 0 : index
    %c1_11 = arith.constant 1 : index
    %13 = vector.load %arg3[%c0_10, %c1_11] : memref<64x4xf32, #tpu.memory_space<vmem>>, vector<64x1xf32>
    %14 = vector.broadcast %13 : vector<64x1xf32> to vector<64x256xf32>
    %15 = arith.addf %12, %14 : vector<64x256xf32>
    %cst_12 = arith.constant 0.000000e+00 : f32
    %16 = vector.broadcast %cst_12 : f32 to vector<64x256xf32>
    %17 = arith.maximumf %15, %16 : vector<64x256xf32>
    %c2 = arith.constant 2 : index
    %c0_13 = arith.constant 0 : index
    %c0_14 = arith.constant 0 : index
    %18 = vector.load %arg2[%c2, %c0_13, %c0_14] : memref<4x64x64xf32, #tpu.memory_space<vmem>>, vector<1x64x64xf32>
    %19 = vector.shape_cast %18 : vector<1x64x64xf32> to vector<64x64xf32>
    %cst_15 = arith.constant dense<0.000000e+00> : vector<64x256xf32>
    %20 = tpu.matmul %19, %17, %cst_15 {dimension_numbers = #tpu.dot_dimension_numbers<[1], [0], [0], [1], [0, 0, 1, 1], [], []>} : vector<64x64xf32>, vector<64x256xf32>, vector<64x256xf32> -> vector<64x256xf32>
    %c0_16 = arith.constant 0 : index
    %c2_17 = arith.constant 2 : index
    %21 = vector.load %arg3[%c0_16, %c2_17] : memref<64x4xf32, #tpu.memory_space<vmem>>, vector<64x1xf32>
    %22 = vector.broadcast %21 : vector<64x1xf32> to vector<64x256xf32>
    %23 = arith.addf %20, %22 : vector<64x256xf32>
    %cst_18 = arith.constant 0.000000e+00 : f32
    %24 = vector.broadcast %cst_18 : f32 to vector<64x256xf32>
    %25 = arith.maximumf %23, %24 : vector<64x256xf32>
    %c3 = arith.constant 3 : index
    %c0_19 = arith.constant 0 : index
    %c0_20 = arith.constant 0 : index
    %26 = vector.load %arg2[%c3, %c0_19, %c0_20] : memref<4x64x64xf32, #tpu.memory_space<vmem>>, vector<1x64x64xf32>
    %27 = vector.shape_cast %26 : vector<1x64x64xf32> to vector<64x64xf32>
    %cst_21 = arith.constant dense<0.000000e+00> : vector<64x256xf32>
    %28 = tpu.matmul %27, %25, %cst_21 {dimension_numbers = #tpu.dot_dimension_numbers<[1], [0], [0], [1], [0, 0, 1, 1], [], []>} : vector<64x64xf32>, vector<64x256xf32>, vector<64x256xf32> -> vector<64x256xf32>
    %29 = vector.extract_strided_slice %28 {offsets = [0, 0], sizes = [4, 256], strides = [1, 1]} : vector<64x256xf32> to vector<4x256xf32>
    %c0_22 = arith.constant 0 : index
    %c3_23 = arith.constant 3 : index
    %30 = vector.load %arg3[%c0_22, %c3_23] : memref<64x4xf32, #tpu.memory_space<vmem>>, vector<4x1xf32>
    %31 = vector.broadcast %30 : vector<4x1xf32> to vector<4x256xf32>
    %32 = arith.addf %29, %31 : vector<4x256xf32>
    %c0_24 = arith.constant 0 : index
    %c0_25 = arith.constant 0 : index
    %33 = vector.load %arg4[%c0_24, %c0_25] : memref<4x256xf32, #tpu.memory_space<vmem>>, vector<4x256xf32>
    tpu.vector_store %arg4[%c0_24, %c0_25], %32 {strides = array<i32>} : memref<4x256xf32, #tpu.memory_space<vmem>>, vector<4x256xf32>,
    return
  }
  func.func @transform_0(%arg0: i32) -> (i32, i32) {
    %c0_i32 = arith.constant 0 : i32
    %c0_i32_0 = arith.constant 0 : i32
    return %arg0, %c0_i32 : i32, i32
  }
  func.func @transform_1(%arg0: i32) -> (i32, i32, i32) {
    %c0_i32 = arith.constant 0 : i32
    %c0_i32_0 = arith.constant 0 : i32
    %c0_i32_1 = arith.constant 0 : i32
    %c0_i32_2 = arith.constant 0 : i32
    return %c0_i32, %c0_i32_0, %c0_i32_1 : i32, i32, i32
  }
  func.func @transform_2(%arg0: i32) -> (i32, i32) {
    %c0_i32 = arith.constant 0 : i32
    %c0_i32_0 = arith.constant 0 : i32
    %c0_i32_1 = arith.constant 0 : i32
    return %c0_i32, %c0_i32_0 : i32, i32
  }
  func.func @transform_3(%arg0: i32) -> (i32, i32) {
    %c0_i32 = arith.constant 0 : i32
    %c0_i32_0 = arith.constant 0 : i32
    return %c0_i32, %arg0 : i32, i32
  }
}

</mosaic_0001>

<bundles_post_ra>
// kernel: tpu_custom_call.1
= control target key start
LH: loop header
LB: loop body
LE: loop exit
PB: predicated region body
PF: predicated region fallthrough
CT: control target
= control target key end

     0   :  { %vm103_vm0 = vcmask 64512   ;;  %s1360_s0 = inlined_call_operand.vmem [shape: f32[256,8], index: 0, kind: input, shape index: {}]   ;;  %s1361_s1 = inlined_call_operand.vmem [shape: f32[4,64,64], index: 1, kind: input, shape index: {}]   ;;  %s1362_s2 = inlined_call_operand.vmem [shape: f32[64,4], index: 2, kind: input, shape index: {}]   ;;  %s1363_s3 = inlined_call_operand.hbm [shape: f32[4,256], index: 3, kind: output, shape index: {}]  }
   0x1   :  { %v30_v0 = vld [vmem:[%s1360_s0 + $0x78] sm:$0xff]  ;;  %v29_v2 = vld [vmem:[%s1360_s0 + $0x70] sm:$0xff]  ;;  %v28_v4 = vld [vmem:[%s1360_s0 + $0x68] sm:$0xff] }
   0x2   :  { %v46_v1 = vld [vmem:[%s1360_s0 + $0xf8] sm:$0xff]  ;;  %781 = vmatpush.xpose.msk.msra.mxu0 %vm103_vm0, %v30_v0  ;;  %v45_v3 = vld [vmem:[%s1360_s0 + $0xf0] sm:$0xff]  ;;  %v44_v5 = vld [vmem:[%s1360_s0 + $0xe8] sm:$0xff] }
   0x3   :  { %805 = vmatpush.xpose.msk.msra.mxu1 %vm103_vm0, %v46_v1 }
   0x6   :  { %782 = vmatpush.xpose.msk.msra.mxu0 %vm103_vm0, %v29_v2 }
   0x7   :  { %806 = vmatpush.xpose.msk.msra.mxu1 %vm103_vm0, %v45_v3 }
   0x8   :  { %8 = vsyncpa [#allocation3], 0  ;;  %v27_v6 = vld [vmem:[%s1360_s0 + $0x60] sm:$0xff]  ;;  %v26_v8 = vld [vmem:[%s1360_s0 + $0x58] sm:$0xff]  ;;  %v959_v17 = vmov 0   ;;  %v960_v62 = vmov 1  }
   0x9   :  { %v43_v7 = vld [vmem:[%s1360_s0 + $0xe0] sm:$0xff]  ;;  %v42_v9 = vld [vmem:[%s1360_s0 + $0xd8] sm:$0xff]  ;;  %v25_v10 = vld [vmem:[%s1360_s0 + $0x50] sm:$0xff]  ;;  %923 = vset.pattern.permute.xlu1 %v959_v17  ;;  %922 = vset.pattern.permute.xlu0 %v959_v17  ;;  %vm363_vm1 = vcmask 523264   ;;  %s963_s19 = smov [#allocation2]   ;;  %s772_s23 = sshll.u32 %s1363_s3, 4  ;;  %s773_s23 = int_to_ptr.hbm [resolvable:$true] %s772_s23 }
   0xa   :  { %783 = vmatpush.xpose.msk.msra.mxu0 %vm103_vm0, %v28_v4  ;;  %v41_v11 = vld [vmem:[%s1360_s0 + $0xd0] sm:$0xff]  ;;  %v24_v12 = vld [vmem:[%s1360_s0 + $0x48] sm:$0xff]  ;;  %v23_v15 = vld [vmem:[%s1360_s0 + $0x40] sm:$0xff]  ;;  %924 = vset.pattern.permute.xlu2 %v959_v17  ;;  %s770_s20 = sshll.u32 %s963_s19, 4  ;;  %vm761_vm2 = vcmask 1043456   ;;  %s771_s20 = int_to_ptr.vmem [resolvable:$true] %s770_s20 }
   0xb   :  { %807 = vmatpush.xpose.msk.msra.mxu1 %vm103_vm0, %v44_v5  ;;  %v40_v13 = vld [vmem:[%s1360_s0 + $0xc8] sm:$0xff]  ;;  %v39_v16 = vld [vmem:[%s1360_s0 + $0xc0] sm:$0xff]  ;;  %v22_v18 = vld [vmem:[%s1360_s0 + $0x38] sm:$0xff] }
   0xc   :  { %v1043_v14 = vld [vmem:[%s1362_s2 + $0x28] sm:$0xff]  ;;  %v38_v19 = vld [vmem:[%s1360_s0 + $0xb8] sm:$0xff]  ;;  %v1068_v21 = vld [vmem:[%s1362_s2 + $0x20] sm:$0xff] }
   0xd   :  { %90 = vperm.xlu1 %923, %v1043_v14   ;;  %v1063_v20 = vld [vmem:[%s1362_s2 + $0x38] sm:$0xff]  ;;  %v21_v22 = vld [vmem:[%s1360_s0 + $0x30] sm:$0xff]  ;;  %v20_v24 = vld [vmem:[%s1360_s0 + $0x28] sm:$0xff] }
   0xe   :  { %784 = vmatpush.xpose.msk.msra.mxu0 %vm103_vm0, %v27_v6  ;;  %v37_v23 = vld [vmem:[%s1360_s0 + $0xb0] sm:$0xff]  ;;  %100 = vperm.xlu0 %922, %v1063_v20   ;;  %v36_v25 = vld [vmem:[%s1360_s0 + $0xa8] sm:$0xff]  ;;  %v1096_v27 = vld [vmem:[%s1362_s2] sm:$0xff] }
   0xf   :  { %808 = vmatpush.xpose.msk.msra.mxu1 %vm103_vm0, %v43_v7  ;;  %v1091_v26 = vld [vmem:[%s1362_s2 + $0x30] sm:$0xff]  ;;  %v19_v28 = vld [vmem:[%s1360_s0 + $0x20] sm:$0xff]  ;;  %v18_v30 = vld [vmem:[%s1360_s0 + $0x18] sm:$0xff] }
  0x10   :  { %v35_v29 = vld [vmem:[%s1360_s0 + $0xa0] sm:$0xff]  ;;  %v34_v31 = vld [vmem:[%s1360_s0 + $0x98] sm:$0xff]  ;;  %v1119_v32 = vld [vmem:[%s1362_s2 + $0x8] sm:$0xff] }
  0x11   :  { %v17_v33 = vld [vmem:[%s1360_s0 + $0x10] sm:$0xff]  ;;  %v16_v35 = vld [vmem:[%s1360_s0 + $0x8] sm:$0xff]  ;;  %v15_v37 = vld [vmem:[%s1360_s0] sm:$0xff] }
  0x12   :  { %785 = vmatpush.xpose.msk.msra.mxu0 %vm103_vm0, %v26_v8  ;;  %v33_v34 = vld [vmem:[%s1360_s0 + $0x90] sm:$0xff]  ;;  %v32_v36 = vld [vmem:[%s1360_s0 + $0x88] sm:$0xff]  ;;  %v31_v38 = vld [vmem:[%s1360_s0 + $0x80] sm:$0xff] }
  0x13   :  { %809 = vmatpush.xpose.msk.msra.mxu1 %vm103_vm0, %v42_v9  ;;  %v47_v39 = vld [vmem:[%s1361_s1] sm:$0xff]  ;;  %v48_v40 = vld [vmem:[%s1361_s1 + $0x8] sm:$0xff]  ;;  %v1161_v41 = vld [vmem:[%s1362_s2 + $0x18] sm:$0xff] }
  0x14   :  { %80 = vperm.xlu2 %924, %v1161_v41   ;;  %v49_v42 = vld [vmem:[%s1361_s1 + $0x10] sm:$0xff]  ;;  %v50_v44 = vld [vmem:[%s1361_s1 + $0x18] sm:$0xff]  ;;  %v51_v45 = vld [vmem:[%s1361_s1 + $0x20] sm:$0xff] }
  0x15   :  { %85 = vperm.xlu1 %923, %v1068_v21   ;;  %v1172_v43 = vld [vmem:[%s1362_s2 + $0x10] sm:$0xff]  ;;  %v52_v46 = vld [vmem:[%s1361_s1 + $0x28] sm:$0xff]  ;;  %v54_v48 = vld [vmem:[%s1361_s1 + $0x38] sm:$0xff] }
  0x16   :  { %786 = vmatpush.xpose.msk.msra.mxu0 %vm103_vm0, %v25_v10  ;;  %95 = vperm.xlu0 %922, %v1091_v26   ;;  %v53_v47 = vld [vmem:[%s1361_s1 + $0x30] sm:$0xff] }
  0x17   :  { %810 = vmatpush.xpose.msk.msra.mxu1 %vm103_vm0, %v41_v11 }
  0x1a   :  { %787 = vmatpush.xpose.msk.msra.mxu0 %vm103_vm0, %v24_v12 }
  0x1b   :  { %811 = vmatpush.xpose.msk.msra.mxu1 %vm103_vm0, %v40_v13 }
  0x1c   :  { %75 = vperm.xlu2 %924, %v1172_v43  }
  0x1d   :  { %65 = vperm.xlu1 %923, %v1096_v27  }
  0x1e   :  { %788 = vmatpush.xpose.msk.msra.mxu0 %vm103_vm0, %v23_v15  ;;  %70 = vperm.xlu0 %922, %v1119_v32  }
  0x1f   :  { %812 = vmatpush.xpose.msk.msra.mxu1 %vm103_vm0, %v39_v16 }
  0x22   :  { %789 = vmatpush.xpose.msk.msra.mxu0 %vm103_vm0, %v22_v18 }
  0x23   :  { %813 = vmatpush.xpose.msk.msra.mxu1 %vm103_vm0, %v38_v19 }
  0x24   :  { %925 = vset.pattern.permute.xlu2 %v960_v62 }
  0x25   :  { %927 = vset.pattern.permute.xlu1 %v960_v62  ;;  %360 = vperm.xlu2 %925, %v1063_v20  }
  0x26   :  { %790 = vmatpush.xpose.msk.msra.mxu0 %vm103_vm0, %v21_v22  ;;  %926 = vset.pattern.permute.xlu0 %v960_v62 }
  0x27   :  { %814 = vmatpush.xpose.msk.msra.mxu1 %vm103_vm0, %v37_v23  ;;  %352 = vperm.xlu1 %927, %v1043_v14  }
  0x28   :  { %356 = vperm.xlu0 %926, %v1091_v26  }
  0x2a   :  { %791 = vmatpush.xpose.msk.msra.mxu0 %vm103_vm0, %v20_v24 }
  0x2b   :  { %815 = vmatpush.xpose.msk.msra.mxu1 %vm103_vm0, %v36_v25 }
  0x2d   :  { %348 = vperm.xlu2 %925, %v1068_v21  }
  0x2e   :  { %792 = vmatpush.xpose.msk.msra.mxu0 %vm103_vm0, %v19_v28 }
  0x2f   :  { %816 = vmatpush.xpose.msk.msra.mxu1 %vm103_vm0, %v35_v29  ;;  %344 = vperm.xlu1 %927, %v1161_v41  }
  0x30   :  { %336 = vperm.xlu0 %926, %v1119_v32  }
  0x32   :  { %793 = vmatpush.xpose.msk.msra.mxu0 %vm103_vm0, %v18_v30 }
  0x33   :  { %817 = vmatpush.xpose.msk.msra.mxu1 %vm103_vm0, %v34_v31 }
  0x35   :  { %340 = vperm.xlu2 %925, %v1172_v43  }
  0x36   :  { %794 = vmatpush.xpose.msk.msra.mxu0 %vm103_vm0, %v17_v33 }
  0x37   :  { %818 = vmatpush.xpose.msk.msra.mxu1 %vm103_vm0, %v33_v34  ;;  %332 = vperm.xlu1 %927, %v1096_v27  }
  0x3a   :  { %795 = vmatpush.xpose.msk.msra.mxu0 %vm103_vm0, %v16_v35 }
  0x3b   :  { %819 = vmatpush.xpose.msk.msra.mxu1 %vm103_vm0, %v32_v36 }
  0x3e   :  { %796 = vmatpush.xpose.msk.msra.mxu0 %vm103_vm0, %v15_v37 }
  0x3f   :  { %820 = vmatpush.xpose.msk.msra.mxu1 %vm103_vm0, %v31_v38 }
  0x41   :  { %797 = vmatmul.msk.f32.vlgmr.msra.gmra.mxu0 %vm103_vm0, %v47_v39 }
  0x42   :  { %821 = vmatmul.msk.f32.vlgmr.msra.gmra.mxu1 %vm103_vm0, %v47_v39 }
  0x49   :  { %798 = vmatmul.msk.f32.gmra.mxu0 %vm103_vm0, %v48_v40 }
  0x4a   :  { %822 = vmatmul.msk.f32.gmra.mxu1 %vm103_vm0, %v48_v40 }
  0x51   :  { %799 = vmatmul.msk.f32.gmra.mxu0 %vm103_vm0, %v49_v42 }
  0x52   :  { %823 = vmatmul.msk.f32.gmra.mxu1 %vm103_vm0, %v49_v42 }
  0x59   :  { %800 = vmatmul.msk.f32.gmra.mxu0 %vm103_vm0, %v50_v44 }
  0x5a   :  { %824 = vmatmul.msk.f32.gmra.mxu1 %vm103_vm0, %v50_v44 }
  0x61   :  { %801 = vmatmul.msk.f32.gmra.mxu0 %vm103_vm0, %v51_v45 }
  0x62   :  { %825 = vmatmul.msk.f32.gmra.mxu1 %vm103_vm0, %v51_v45 }
  0x69   :  { %802 = vmatmul.msk.f32.gmra.mxu0 %vm103_vm0, %v52_v46 }
  0x6a   :  { %826 = vmatmul.msk.f32.gmra.mxu1 %vm103_vm0, %v52_v46 }
  0x6e   :  { %v81_v2 = vpop.permute.xlu2 %80 }
  0x71   :  { %803 = vmatmul.msk.f32.gmra.mxu0 %vm103_vm0, %v53_v47 }
  0x72   :  { %827 = vmatmul.msk.f32.gmra.mxu1 %vm103_vm0, %v53_v47 }
  0x76   :  { %v76_v22 = vpop.permute.xlu2 %75 }
  0x79   :  { %804 = vmatmul.msk.f32.gmra.mxu0 %vm103_vm0, %v54_v48 }
  0x7a   :  { %828 = vmatmul.msk.f32.gmra.mxu1 %vm103_vm0, %v54_v48 }
  0x7f   :  { %v91_v63 = vpop.permute.xlu1 %90 }
  0x80   :  { %v101_v61 = vpop.permute.xlu0 %100 }
  0x87   :  { %v86_v4 = vpop.permute.xlu1 %85 }
  0x88   :  { %v96_v3 = vpop.permute.xlu0 %95 }
  0x8f   :  { %v66_v35 = vpop.permute.xlu1 %65 }
  0x90   :  { %v71_v29 = vpop.permute.xlu0 %70 }
  0xbe   :  { %v1200_v49 = vpop.f32.mrf.mxu0 }
  0xbf   :  { %v1202_v50 = vpop.f32.mrf.mxu1  ;;  %v242_v40 = vadd.f32 %v1200_v49, %v66_v35  ;;  %v830_v49 = vld [vmem:[%s1361_s1 + $0x48] sm:$0xff] }
  0xc0   :  { %v283_v42 = vadd.f32 %v1202_v50, %v66_v35  ;;  %v831_v50 = vld [vmem:[%s1361_s1 + $0x50] sm:$0xff] }
  0xc1   :  { %v306_v48 = vmax.f32 %v242_v40, 0.0 }
  0xc6   :  { %v244_v51 = vpop.f32.mrf.mxu0 }
  0xc7   :  { %v285_v52 = vpop.f32.mrf.mxu1  ;;  %v245_v36 = vadd.f32 %v244_v51, %v71_v29  ;;  %v829_v51 = vld [vmem:[%s1361_s1 + $0x40] sm:$0xff] }
  0xc8   :  { %v286_v37 = vadd.f32 %v285_v52, %v71_v29  ;;  %v832_v52 = vld [vmem:[%s1361_s1 + $0x58] sm:$0xff] }
  0xc9   :  { %v308_v46 = vmax.f32 %v245_v36, 0.0 }
  0xca   :  { %v309_v47 = vmax.f32 %v286_v37, 0.0 }
  0xce   :  { %v247_v53 = vpop.f32.mrf.mxu0 }
  0xcf   :  { %v288_v54 = vpop.f32.mrf.mxu1  ;;  %v248_v30 = vadd.f32 %v247_v53, %v76_v22  ;;  %v307_v53 = vmax.f32 %v283_v42, 0.0 }
  0xd0   :  { %v289_v31 = vadd.f32 %v288_v54, %v76_v22  ;;  %v833_v54 = vld [vmem:[%s1361_s1 + $0x60] sm:$0xff] }
  0xd1   :  { %v310_v44 = vmax.f32 %v248_v30, 0.0 }
  0xd2   :  { %v311_v45 = vmax.f32 %v289_v31, 0.0 }
  0xd6   :  { %v250_v55 = vpop.f32.mrf.mxu0 }
  0xd7   :  { %v291_v56 = vpop.f32.mrf.mxu1  ;;  %v251_v23 = vadd.f32 %v250_v55, %v81_v2  ;;  %v834_v55 = vld [vmem:[%s1361_s1 + $0x68] sm:$0xff] }
  0xd8   :  { %v292_v24 = vadd.f32 %v291_v56, %v81_v2  ;;  %v835_v56 = vld [vmem:[%s1361_s1 + $0x70] sm:$0xff] }
  0xd9   :  { %v312_v38 = vmax.f32 %v251_v23, 0.0 }
  0xda   :  { %v313_v39 = vmax.f32 %v292_v24, 0.0 }
  0xde   :  { %v253_v57 = vpop.f32.mrf.mxu0 }
  0xdf   :  { %v294_v58 = vpop.f32.mrf.mxu1  ;;  %v254_v16 = vadd.f32 %v253_v57, %v86_v4  ;;  %v836_v57 = vld [vmem:[%s1361_s1 + $0x78] sm:$0xff] }
  0xe0   :  { %v295_v17 = vadd.f32 %v294_v58, %v86_v4 }
  0xe1   :  { %v314_v33 = vmax.f32 %v254_v16, 0.0 }
  0xe2   :  { %v315_v34 = vmax.f32 %v295_v17, 0.0 }
  0xe6   :  { %v256_v59 = vpop.f32.mrf.mxu0 }
  0xe7   :  { %v297_v60 = vpop.f32.mrf.mxu1  ;;  %v257_v11 = vadd.f32 %v256_v59, %v91_v63 }
  0xe8   :  { %v298_v12 = vadd.f32 %v297_v60, %v91_v63 }
  0xe9   :  { %v316_v25 = vmax.f32 %v257_v11, 0.0 }
  0xea   :  { %v317_v28 = vmax.f32 %v298_v12, 0.0  ;;  %v357_v12 = vpop.permute.xlu0 %356 }
  0xee   :  { %v259_v0 = vpop.f32.mrf.mxu0 }
  0xef   :  { %v300_v1 = vpop.f32.mrf.mxu1  ;;  %v260_v7 = vadd.f32 %v259_v0, %v96_v3 }
  0xf0   :  { %v301_v8 = vadd.f32 %v300_v1, %v96_v3 }
  0xf1   :  { %v318_v18 = vmax.f32 %v260_v7, 0.0  ;;  %v961_v7 = vmov 2  }
  0xf2   :  { %v319_v19 = vmax.f32 %v301_v8, 0.0  ;;  %930 = vset.pattern.permute.xlu1 %v961_v7  ;;  %929 = vset.pattern.permute.xlu0 %v961_v7  ;;  %v353_v8 = vpop.permute.xlu1 %352 }
  0xf3   :  { %516 = vperm.xlu1 %930, %v1043_v14   ;;  %520 = vperm.xlu0 %929, %v1091_v26  }
  0xf4   :  { %928 = vset.pattern.permute.xlu2 %v961_v7 }
  0xf5   :  { %524 = vperm.xlu2 %928, %v1063_v20  }
  0xf6   :  { %v262_v5 = vpop.f32.mrf.mxu0 }
  0xf7   :  { %v303_v6 = vpop.f32.mrf.mxu1  ;;  %v263_v9 = vadd.f32 %v262_v5, %v101_v61 }
  0xf8   :  { %v304_v10 = vadd.f32 %v303_v6, %v101_v61  ;;  %v361_v6 = vpop.permute.xlu2 %360 }
  0xf9   :  { %v320_v13 = vmax.f32 %v263_v9, 0.0 }
  0xfa   :  { %v321_v15 = vmax.f32 %v304_v10, 0.0 }
  0xfb   :  { %396 = vmatpush.msra.mxu2 %v320_v13  ;;  %508 = vperm.xlu1 %930, %v1161_v41   ;;  %v345_v13 = vpop.permute.xlu1 %344 }
  0xfc   :  { %437 = vmatpush.msra.mxu3 %v321_v15  ;;  %500 = vperm.xlu0 %929, %v1119_v32  }
  0xfd   :  { %397 = vmatpush.msra.mxu2 %v318_v18  ;;  %512 = vperm.xlu2 %928, %v1068_v21  }
  0xfe   :  { %438 = vmatpush.msra.mxu3 %v319_v19 }
  0xff   :  { %398 = vmatpush.msra.mxu2 %v316_v25 }
 0x100   :  { %439 = vmatpush.msra.mxu3 %v317_v28  ;;  %v349_v11 = vpop.permute.xlu2 %348 }
 0x101   :  { %399 = vmatpush.msra.mxu2 %v314_v33  ;;  %v337_v33 = vpop.permute.xlu0 %336 }
 0x102   :  { %440 = vmatpush.msra.mxu3 %v315_v34 }
 0x103   :  { %400 = vmatpush.msra.mxu2 %v312_v38  ;;  %496 = vperm.xlu1 %930, %v1096_v27   ;;  %v333_v38 = vpop.permute.xlu1 %332 }
 0x104   :  { %441 = vmatpush.msra.mxu3 %v313_v39 }
 0x105   :  { %401 = vmatpush.msra.mxu2 %v310_v44  ;;  %504 = vperm.xlu2 %928, %v1172_v43  }
 0x106   :  { %442 = vmatpush.msra.mxu3 %v311_v45 }
 0x107   :  { %402 = vmatpush.msra.mxu2 %v308_v46 }
 0x108   :  { %443 = vmatpush.msra.mxu3 %v309_v47  ;;  %v341_v32 = vpop.permute.xlu2 %340 }
 0x109   :  { %403 = vmatpush.msra.mxu2 %v306_v48 }
 0x10a   :  { %444 = vmatpush.msra.mxu3 %v307_v53  ;;  %837 = vmatmul.msk.f32.vlgmr.msra.gmra.mxu2 %vm363_vm1, %v829_v51 }
 0x10b   :  { %845 = vmatmul.msk.f32.vlgmr.msra.gmra.mxu3 %vm363_vm1, %v829_v51 }
 0x112   :  { %838 = vmatmul.msk.f32.gmra.mxu2 %vm363_vm1, %v830_v49 }
 0x113   :  { %846 = vmatmul.msk.f32.gmra.mxu3 %vm363_vm1, %v830_v49  ;;  %v853_v49 = vld [vmem:[%s1361_s1 + $0x80] sm:$0xff] }
 0x11a   :  { %839 = vmatmul.msk.f32.gmra.mxu2 %vm363_vm1, %v831_v50 }
 0x11b   :  { %847 = vmatmul.msk.f32.gmra.mxu3 %vm363_vm1, %v831_v50  ;;  %v854_v50 = vld [vmem:[%s1361_s1 + $0x88] sm:$0xff] }
 0x122   :  { %840 = vmatmul.msk.f32.gmra.mxu2 %vm363_vm1, %v832_v52 }
 0x123   :  { %848 = vmatmul.msk.f32.gmra.mxu3 %vm363_vm1, %v832_v52  ;;  %v855_v52 = vld [vmem:[%s1361_s1 + $0x90] sm:$0xff] }
 0x12a   :  { %841 = vmatmul.msk.f32.gmra.mxu2 %vm363_vm1, %v833_v54 }
 0x12b   :  { %849 = vmatmul.msk.f32.gmra.mxu3 %vm363_vm1, %v833_v54  ;;  %v856_v54 = vld [vmem:[%s1361_s1 + $0x98] sm:$0xff] }
 0x132   :  { %842 = vmatmul.msk.f32.gmra.mxu2 %vm363_vm1, %v834_v55 }
 0x133   :  { %850 = vmatmul.msk.f32.gmra.mxu3 %vm363_vm1, %v834_v55  ;;  %v857_v55 = vld [vmem:[%s1361_s1 + $0xa0] sm:$0xff] }
 0x13a   :  { %843 = vmatmul.msk.f32.gmra.mxu2 %vm363_vm1, %v835_v56 }
 0x13b   :  { %851 = vmatmul.msk.f32.gmra.mxu3 %vm363_vm1, %v835_v56  ;;  %v858_v56 = vld [vmem:[%s1361_s1 + $0xa8] sm:$0xff] }
 0x142   :  { %844 = vmatmul.msk.f32.gmra.mxu2 %vm363_vm1, %v836_v57 }
 0x143   :  { %852 = vmatmul.msk.f32.gmra.mxu3 %vm363_vm1, %v836_v57  ;;  %v859_v57 = vld [vmem:[%s1361_s1 + $0xb0] sm:$0xff] }
 0x14f   :  { %v525_v7 = vpop.permute.xlu2 %524 }
 0x18d   :  { %v1254_v58 = vpop.f32.mrf.mxu2 }
 0x18e   :  { %v1256_v59 = vpop.f32.mrf.mxu3  ;;  %v406_v44 = vadd.f32 %v1254_v58, %v333_v38  ;;  %v860_v58 = vld [vmem:[%s1361_s1 + $0xb8] sm:$0xff] }
 0x18f   :  { %v447_v45 = vadd.f32 %v1256_v59, %v333_v38 }
 0x190   :  { %v470_v53 = vmax.f32 %v406_v44, 0.0 }
 0x191   :  { %v471_v51 = vmax.f32 %v447_v45, 0.0 }
 0x195   :  { %v408_v60 = vpop.f32.mrf.mxu2 }
 0x196   :  { %v449_v61 = vpop.f32.mrf.mxu3  ;;  %v409_v39 = vadd.f32 %v408_v60, %v337_v33 }
 0x197   :  { %v450_v40 = vadd.f32 %v449_v61, %v337_v33 }
 0x198   :  { %v472_v43 = vmax.f32 %v409_v39, 0.0 }
 0x199   :  { %v473_v48 = vmax.f32 %v450_v40, 0.0 }
 0x19d   :  { %v411_v62 = vpop.f32.mrf.mxu2 }
 0x19e   :  { %v452_v63 = vpop.f32.mrf.mxu3  ;;  %v412_v34 = vadd.f32 %v411_v62, %v341_v32 }
 0x19f   :  { %v453_v35 = vadd.f32 %v452_v63, %v341_v32 }
 0x1a0   :  { %v474_v46 = vmax.f32 %v412_v34, 0.0 }
 0x1a1   :  { %v475_v47 = vmax.f32 %v453_v35, 0.0 }
 0x1a5   :  { %v414_v0 = vpop.f32.mrf.mxu2 }
 0x1a6   :  { %v455_v1 = vpop.f32.mrf.mxu3  ;;  %v415_v21 = vadd.f32 %v414_v0, %v345_v13 }
 0x1a7   :  { %v456_v29 = vadd.f32 %v455_v1, %v345_v13 }
 0x1a8   :  { %v476_v42 = vmax.f32 %v415_v21, 0.0 }
 0x1a9   :  { %v477_v27 = vmax.f32 %v456_v29, 0.0 }
 0x1ad   :  { %v417_v2 = vpop.f32.mrf.mxu2 }
 0x1ae   :  { %v458_v3 = vpop.f32.mrf.mxu3  ;;  %v418_v24 = vadd.f32 %v417_v2, %v349_v11 }
 0x1af   :  { %v459_v25 = vadd.f32 %v458_v3, %v349_v11  ;;  %v513_v11 = vpop.permute.xlu2 %512 }
 0x1b0   :  { %v478_v36 = vmax.f32 %v418_v24, 0.0 }
 0x1b1   :  { %v479_v37 = vmax.f32 %v459_v25, 0.0 }
 0x1b5   :  { %v420_v4 = vpop.f32.mrf.mxu2 }
 0x1b6   :  { %v461_v5 = vpop.f32.mrf.mxu3  ;;  %v421_v19 = vadd.f32 %v420_v4, %v353_v8 }
 0x1b7   :  { %v462_v22 = vadd.f32 %v461_v5, %v353_v8  ;;  %v517_v8 = vpop.permute.xlu1 %516 }
 0x1b8   :  { %v480_v30 = vmax.f32 %v421_v19, 0.0 }
 0x1b9   :  { %v481_v31 = vmax.f32 %v462_v22, 0.0 }
 0x1bd   :  { %v423_v9 = vpop.f32.mrf.mxu2 }
 0x1be   :  { %v464_v10 = vpop.f32.mrf.mxu3  ;;  %v424_v17 = vadd.f32 %v423_v9, %v357_v12 }
 0x1bf   :  { %v465_v14 = vadd.f32 %v464_v10, %v357_v12  ;;  %v521_v12 = vpop.permute.xlu0 %520  ;;  %v509_v13 = vpop.permute.xlu1 %508 }
 0x1c0   :  { %v482_v28 = vmax.f32 %v424_v17, 0.0 }
 0x1c1   :  { %v483_v41 = vmax.f32 %v465_v14, 0.0 }
 0x1c5   :  { %v426_v15 = vpop.f32.mrf.mxu2 }
 0x1c6   :  { %v467_v16 = vpop.f32.mrf.mxu3  ;;  %v427_v18 = vadd.f32 %v426_v15, %v361_v6 }
 0x1c7   :  { %v468_v26 = vadd.f32 %v467_v16, %v361_v6 }
 0x1c8   :  { %v484_v20 = vmax.f32 %v427_v18, 0.0 }
 0x1c9   :  { %v485_v23 = vmax.f32 %v468_v26, 0.0 }
 0x1ca   :  { %559 = vmatpush.msrb.mxu2 %v484_v20 }
 0x1cb   :  { %600 = vmatpush.msrb.mxu3 %v485_v23 }
 0x1cc   :  { %560 = vmatpush.msrb.mxu2 %v482_v28  ;;  %v505_v28 = vpop.permute.xlu2 %504 }
 0x1cd   :  { %601 = vmatpush.msrb.mxu3 %v483_v41 }
 0x1ce   :  { %561 = vmatpush.msrb.mxu2 %v480_v30  ;;  %v501_v30 = vpop.permute.xlu0 %500 }
 0x1cf   :  { %602 = vmatpush.msrb.mxu3 %v481_v31 }
 0x1d0   :  { %562 = vmatpush.msrb.mxu2 %v478_v36  ;;  %v497_v36 = vpop.permute.xlu1 %496 }
 0x1d1   :  { %603 = vmatpush.msrb.mxu3 %v479_v37 }
 0x1d2   :  { %563 = vmatpush.msrb.mxu2 %v476_v42 }
 0x1d3   :  { %604 = vmatpush.msrb.mxu3 %v477_v27 }
 0x1d4   :  { %564 = vmatpush.msrb.mxu2 %v474_v46 }
 0x1d5   :  { %605 = vmatpush.msrb.mxu3 %v475_v47 }
 0x1d6   :  { %565 = vmatpush.msrb.mxu2 %v472_v43 }
 0x1d7   :  { %606 = vmatpush.msrb.mxu3 %v473_v48 }
 0x1d8   :  { %566 = vmatpush.msrb.mxu2 %v470_v53 }
 0x1d9   :  { %607 = vmatpush.msrb.mxu3 %v471_v51  ;;  %861 = vmatmul.msk.f32.vlgmr.msrb.gmra.mxu2 %vm363_vm1, %v853_v49 }
 0x1da   :  { %869 = vmatmul.msk.f32.vlgmr.msrb.gmra.mxu3 %vm363_vm1, %v853_v49  ;;  %v877_v49 = vld [vmem:[%s1361_s1 + $0xc0] sm:$0xff] }
 0x1e1   :  { %862 = vmatmul.msk.f32.gmra.mxu2 %vm363_vm1, %v854_v50 }
 0x1e2   :  { %870 = vmatmul.msk.f32.gmra.mxu3 %vm363_vm1, %v854_v50  ;;  %v882_v50 = vld [vmem:[%s1361_s1 + $0xe8] sm:$0xff] }
 0x1e9   :  { %863 = vmatmul.msk.f32.gmra.mxu2 %vm363_vm1, %v855_v52 }
 0x1ea   :  { %871 = vmatmul.msk.f32.gmra.mxu3 %vm363_vm1, %v855_v52  ;;  %v750_v52 = vld [vmem:[%s1362_s2] sm:$0xf] }
 0x1f1   :  { %864 = vmatmul.msk.f32.gmra.mxu2 %vm363_vm1, %v856_v54 }
 0x1f2   :  { %872 = vmatmul.msk.f32.gmra.mxu3 %vm363_vm1, %v856_v54  ;;  %v962_v54 = vmov 3  }
 0x1f3   :  { %931 = vset.pattern.permute.xlu2 %v962_v54  ;;  %932 = vset.pattern.permute.xlu0 %v962_v54 }
 0x1f4   :  { %753 = vperm.xlu2 %931, %v750_v52  }
 0x1f9   :  { %865 = vmatmul.msk.f32.gmra.mxu2 %vm363_vm1, %v857_v55 }
 0x1fa   :  { %873 = vmatmul.msk.f32.gmra.mxu3 %vm363_vm1, %v857_v55  ;;  %v878_v55 = vld [vmem:[%s1361_s1 + $0xc8] sm:$0xff] }
 0x201   :  { %866 = vmatmul.msk.f32.gmra.mxu2 %vm363_vm1, %v858_v56 }
 0x202   :  { %874 = vmatmul.msk.f32.gmra.mxu3 %vm363_vm1, %v858_v56  ;;  %v883_v56 = vld [vmem:[%s1361_s1 + $0xf0] sm:$0xff] }
 0x209   :  { %867 = vmatmul.msk.f32.gmra.mxu2 %vm363_vm1, %v859_v57 }
 0x20a   :  { %875 = vmatmul.msk.f32.gmra.mxu3 %vm363_vm1, %v859_v57  ;;  %v879_v57 = vld [vmem:[%s1361_s1 + $0xd0] sm:$0xff] }
 0x211   :  { %868 = vmatmul.msk.f32.gmra.mxu2 %vm363_vm1, %v860_v58 }
 0x212   :  { %876 = vmatmul.msk.f32.gmra.mxu3 %vm363_vm1, %v860_v58  ;;  %v884_v58 = vld [vmem:[%s1361_s1 + $0xf8] sm:$0xff] }
 0x25c   :  { %v1308_v59 = vpop.f32.mrf.mxu2 }
 0x25d   :  { %v1310_v60 = vpop.f32.mrf.mxu3  ;;  %v569_v44 = vadd.f32 %v1308_v59, %v497_v36  ;;  %v880_v59 = vld [vmem:[%s1361_s1 + $0xd8] sm:$0xff] }
 0x25e   :  { %v610_v46 = vadd.f32 %v1310_v60, %v497_v36  ;;  %v881_v60 = vld [vmem:[%s1361_s1 + $0xe0] sm:$0xff] }
 0x25f   :  { %v633_v53 = vmax.f32 %v569_v44, 0.0 }
 0x260   :  { %v634_v51 = vmax.f32 %v610_v46, 0.0 }
 0x264   :  { %v571_v61 = vpop.f32.mrf.mxu2 }
 0x265   :  { %v612_v62 = vpop.f32.mrf.mxu3  ;;  %v572_v39 = vadd.f32 %v571_v61, %v501_v30  ;;  %v754_v61 = vpop.permute.xlu2 %753 }
 0x266   :  { %v613_v42 = vadd.f32 %v612_v62, %v501_v30 }
 0x267   :  { %v635_v43 = vmax.f32 %v572_v39, 0.0 }
 0x268   :  { %v636_v48 = vmax.f32 %v613_v42, 0.0 }
 0x26c   :  { %v574_v63 = vpop.f32.mrf.mxu2 }
 0x26d   :  { %v615_v0 = vpop.f32.mrf.mxu3  ;;  %v575_v34 = vadd.f32 %v574_v63, %v505_v28 }
 0x26e   :  { %v616_v37 = vadd.f32 %v615_v0, %v505_v28 }
 0x26f   :  { %v637_v45 = vmax.f32 %v575_v34, 0.0 }
 0x270   :  { %v638_v47 = vmax.f32 %v616_v37, 0.0 }
 0x274   :  { %v577_v1 = vpop.f32.mrf.mxu2 }
 0x275   :  { %v618_v2 = vpop.f32.mrf.mxu3  ;;  %v578_v21 = vadd.f32 %v577_v1, %v509_v13 }
 0x276   :  { %v619_v31 = vadd.f32 %v618_v2, %v509_v13 }
 0x277   :  { %v639_v40 = vmax.f32 %v578_v21, 0.0 }
 0x278   :  { %v640_v27 = vmax.f32 %v619_v31, 0.0 }
 0x27c   :  { %v580_v3 = vpop.f32.mrf.mxu2 }
 0x27d   :  { %v621_v4 = vpop.f32.mrf.mxu3  ;;  %v581_v24 = vadd.f32 %v580_v3, %v513_v11 }
 0x27e   :  { %v622_v41 = vadd.f32 %v621_v4, %v513_v11 }
 0x27f   :  { %v641_v35 = vmax.f32 %v581_v24, 0.0 }
 0x280   :  { %v642_v38 = vmax.f32 %v622_v41, 0.0 }
 0x284   :  { %v583_v5 = vpop.f32.mrf.mxu2 }
 0x285   :  { %v624_v6 = vpop.f32.mrf.mxu3  ;;  %v584_v19 = vadd.f32 %v583_v5, %v517_v8 }
 0x286   :  { %v625_v23 = vadd.f32 %v624_v6, %v517_v8 }
 0x287   :  { %v643_v29 = vmax.f32 %v584_v19, 0.0 }
 0x288   :  { %v644_v33 = vmax.f32 %v625_v23, 0.0 }
 0x28c   :  { %v586_v9 = vpop.f32.mrf.mxu2 }
 0x28d   :  { %v627_v10 = vpop.f32.mrf.mxu3  ;;  %v587_v17 = vadd.f32 %v586_v9, %v521_v12 }
 0x28e   :  { %v628_v26 = vadd.f32 %v627_v10, %v521_v12 }
 0x28f   :  { %v645_v25 = vmax.f32 %v587_v17, 0.0 }
 0x290   :  { %v646_v32 = vmax.f32 %v628_v26, 0.0 }
 0x294   :  { %v589_v15 = vpop.f32.mrf.mxu2 }
 0x295   :  { %v630_v16 = vpop.f32.mrf.mxu3  ;;  %v590_v14 = vadd.f32 %v589_v15, %v525_v7 }
 0x296   :  { %v631_v18 = vadd.f32 %v630_v16, %v525_v7 }
 0x297   :  { %v647_v22 = vmax.f32 %v590_v14, 0.0 }
 0x298   :  { %v648_v20 = vmax.f32 %v631_v18, 0.0 }
 0x299   :  { %690 = vmatpush.msrb.mxu0 %v647_v22  ;;  %901 = vmatpush.msra.mxu2 %v647_v22 }
 0x29a   :  { %724 = vmatpush.msrb.mxu1 %v648_v20  ;;  %909 = vmatpush.msra.mxu3 %v648_v20 }
 0x29b   :  { %691 = vmatpush.msrb.mxu0 %v645_v25  ;;  %902 = vmatpush.msra.mxu2 %v645_v25 }
 0x29c   :  { %725 = vmatpush.msrb.mxu1 %v646_v32  ;;  %910 = vmatpush.msra.mxu3 %v646_v32 }
 0x29d   :  { %692 = vmatpush.msrb.mxu0 %v643_v29  ;;  %903 = vmatpush.msra.mxu2 %v643_v29 }
 0x29e   :  { %726 = vmatpush.msrb.mxu1 %v644_v33  ;;  %911 = vmatpush.msra.mxu3 %v644_v33 }
 0x29f   :  { %693 = vmatpush.msrb.mxu0 %v641_v35  ;;  %904 = vmatpush.msra.mxu2 %v641_v35 }
 0x2a0   :  { %727 = vmatpush.msrb.mxu1 %v642_v38  ;;  %912 = vmatpush.msra.mxu3 %v642_v38 }
 0x2a1   :  { %694 = vmatpush.msrb.mxu0 %v639_v40  ;;  %905 = vmatpush.msra.mxu2 %v639_v40 }
 0x2a2   :  { %728 = vmatpush.msrb.mxu1 %v640_v27  ;;  %913 = vmatpush.msra.mxu3 %v640_v27 }
 0x2a3   :  { %695 = vmatpush.msrb.mxu0 %v637_v45  ;;  %906 = vmatpush.msra.mxu2 %v637_v45 }
 0x2a4   :  { %729 = vmatpush.msrb.mxu1 %v638_v47  ;;  %914 = vmatpush.msra.mxu3 %v638_v47 }
 0x2a5   :  { %696 = vmatpush.msrb.mxu0 %v635_v43  ;;  %907 = vmatpush.msra.mxu2 %v635_v43 }
 0x2a6   :  { %730 = vmatpush.msrb.mxu1 %v636_v48  ;;  %915 = vmatpush.msra.mxu3 %v636_v48 }
 0x2a7   :  { %697 = vmatpush.msrb.mxu0 %v633_v53  ;;  %908 = vmatpush.msra.mxu2 %v633_v53 }
 0x2a8   :  { %731 = vmatpush.msrb.mxu1 %v634_v51  ;;  %916 = vmatpush.msra.mxu3 %v634_v51 }
 0x2a9   :  { %893 = vmatmul.msk.f32.vlgmr.msrb.gmra.mxu1 %vm363_vm1, %v877_v49  ;;  %885 = vmatmul.msk.f32.vlgmr.msrb.gmra.mxu0 %vm363_vm1, %v877_v49 }
 0x2aa   :  { %890 = vmatmul.msk.f32.vlgmr.msra.gmra.mxu2 %vm363_vm1, %v882_v50  ;;  %898 = vmatmul.msk.f32.vlgmr.msra.gmra.mxu3 %vm363_vm1, %v882_v50 }
 0x2b1   :  { %886 = vmatmul.msk.f32.gmra.mxu0 %vm363_vm1, %v878_v55  ;;  %894 = vmatmul.msk.f32.gmra.mxu1 %vm363_vm1, %v878_v55 }
 0x2b2   :  { %891 = vmatmul.msk.f32.gmra.mxu2 %vm363_vm1, %v883_v56  ;;  %899 = vmatmul.msk.f32.gmra.mxu3 %vm363_vm1, %v883_v56 }
 0x2b9   :  { %887 = vmatmul.msk.f32.gmra.mxu0 %vm363_vm1, %v879_v57  ;;  %895 = vmatmul.msk.f32.gmra.mxu1 %vm363_vm1, %v879_v57 }
 0x2ba   :  { %892 = vmatmul.msk.f32.gmra.mxu2 %vm363_vm1, %v884_v58  ;;  %900 = vmatmul.msk.f32.gmra.mxu3 %vm363_vm1, %v884_v58 }
 0x2c1   :  { %888 = vmatmul.msk.f32.gmra.mxu0 %vm363_vm1, %v880_v59  ;;  %896 = vmatmul.msk.f32.gmra.mxu1 %vm363_vm1, %v880_v59 }
 0x2c9   :  { %889 = vmatmul.msk.f32.gmra.mxu0 %vm363_vm1, %v881_v60  ;;  %897 = vmatmul.msk.f32.gmra.mxu1 %vm363_vm1, %v881_v60 }
 0x326   :  { %v733_v62 = vpop.f32.mrf.mxu1  ;;  %v699_v63 = vpop.f32.mrf.mxu0 }
 0x327   :  { %v757_v0 = vadd.f32 %v754_v61, %v733_v62  ;;  %v756_v2 = vadd.f32 %v754_v61, %v699_v63 }
 0x329   :  { %v760_v1 = vrot.slane %v757_v0, 4 }
 0x32b   :  { %v762_v3 = vsel %vm761_vm2, %v756_v2, %v760_v1 }
 0x32c   :  { %764 = vst [vmem:[#allocation2] sm:$0xff] %v762_v3 }
 0x32d   :  { %v710_v4 = vpop.f32.mrf.mxu2  ;;  %v744_v5 = vpop.f32.mrf.mxu3  ;;  %775 = dma.vmem_to_hbm [thread:$0]  %s771_s20, 128, %s773_s23, [#allocation3]  }
 0x32e   :  { %v702_v6 = vpop.f32.mrf.mxu0  ;;  %v736_v7 = vpop.f32.mrf.mxu1 }
 0x335   :  { %v712_v8 = vpop.f32.mrf.mxu2  ;;  %v746_v9 = vpop.f32.mrf.mxu3 }
 0x336   :  { %v704_v10 = vpop.f32.mrf.mxu0  ;;  %v738_v11 = vpop.f32.mrf.mxu1 }
 0x33d   :  { %v714_v12 = vpop.f32.mrf.mxu2  ;;  %v748_v13 = vpop.f32.mrf.mxu3 }
 0x33e   :  { %v706_v15 = vpop.f32.mrf.mxu0  ;;  %v740_v16 = vpop.f32.mrf.mxu1 }
 0x346   :  { %v708_v17 = vpop.f32.mrf.mxu0  ;;  %v742_v14 = vpop.f32.mrf.mxu1 }
 0x347   :  { %957 = dma.done.wait [#allocation3], 128  }
 0x348   :  { %958 = vsyncadd [#allocation3], 4294967168 }
 0x349   :  { %780 = vsyncpa [#allocation3], 1 }

</bundles_post_ra>
